<compile_context>
chip_gen: v7x
topology: tpu7x:2x2x1
jax: 0.10.0
libtpu: 0.0.40
codegen_flags: <defaults>
</compile_context>

<pallas_src>
import functools
import math

import jax
import jax.numpy as jnp
from jax.experimental import pallas as pl
from jax.experimental.pallas import tpu as pltpu


def _layernorm_kernel(x_ref, a_ref, b_ref, o_ref, *, eps):
    """Normalize each row of one (tile_rows, features) block over the lane axis."""
    x = x_ref[...].astype(jnp.float32)               # (tile_rows, features)
    n = x.shape[-1]

    # One-pass moments: the two lane reductions are independent -> better XLU overlap.
    sum_x = jnp.sum(x, axis=-1, keepdims=True)       # (tile_rows, 1)
    sum_x2 = jnp.sum(x * x, axis=-1, keepdims=True)  # (tile_rows, 1)
    mean = sum_x * (1.0 / n)
    # torch.std default is unbiased (Bessel correction): divide by N-1.
    var = (sum_x2 - n * mean * mean) * (1.0 / (n - 1))
    var = jnp.maximum(var, 0.0)                      # guard tiny negative cancellation
    std = jnp.sqrt(var)

    # Divide only on the (tile_rows, 1) column (one EUP op per row, not per element).
    # Exact divide (not approx reciprocal) to keep bit-parity with the torch formula.
    inv = 1.0 / (std + eps)

    a = a_ref[...].astype(jnp.float32)               # (1, features), already f32
    b = b_ref[...].astype(jnp.float32)               # (1, features), already f32
    y = a * ((x - mean) * inv) + b
    o_ref[...] = y.astype(o_ref.dtype)


# Sublane packing per itemsize: f32 -> 8, bf16 -> 16, int8/fp8 -> 32.
_SUBLANE = {1: 32, 2: 16, 4: 8}


def _pick_tile_rows(rows, features, in_dtype, out_dtype):
    in_size = jnp.dtype(in_dtype).itemsize
    out_size = jnp.dtype(out_dtype).itemsize
    sublane = _SUBLANE.get(max(in_size, out_size), 8)
    # Keep a single x block <= ~8 MiB so double-buffered (in + out) stays around
    # <= ~32-40 MiB: safe on v7x (64 MiB physical VMEM) and big enough to sit at
    # ~85% of HBM roofline on v5e/v6e.
    per_block_budget = 8 * 1024 * 1024
    max_rows = max(sublane, per_block_budget // max(1, features * max(in_size, out_size)))
    tile = min(rows, max_rows, 1024)
    if tile >= sublane:
        tile = (tile // sublane) * sublane           # whole-vreg sublane packing
    else:
        tile = rows                                  # tiny inputs: full-extent block
    return tile


def _vmem_limit_bytes(tile_rows, features, in_dtype, out_dtype):
    in_size = jnp.dtype(in_dtype).itemsize
    out_size = jnp.dtype(out_dtype).itemsize
    block_bytes = tile_rows * features * (in_size + out_size)   # in block + out block
    params_bytes = 2 * features * 4                              # a_2, b_2 (f32)
    needed = 2 * (block_bytes + params_bytes) + (2 << 20)        # double-buffer + slack
    return int(max(needed, 32 << 20))                            # small by construction


def layer_norm(x, a_2, b_2, eps=1e-6, *, tile_rows=None):
    """LayerNorm over the last axis of x (any leading shape)."""
    features = x.shape[-1]
    lead_shape = x.shape[:-1]
    rows = math.prod(lead_shape) if lead_shape else 1

    x2 = x.reshape(rows, features)
    # Cast params to f32 once here rather than per grid step inside the kernel.
    a2 = a_2.astype(jnp.float32).reshape(1, features)
    b2 = b_2.astype(jnp.float32).reshape(1, features)

    out_dtype = x.dtype
    if tile_rows is None:
        tile_rows = _pick_tile_rows(rows, features, x.dtype, out_dtype)

    # No divisibility requirement: Pallas pads reads / masks writes on the
    # boundary block, and every row is computed independently.
    grid = (pl.cdiv(rows, tile_rows),)

    out = pl.pallas_call(
        functools.partial(_layernorm_kernel, eps=eps),
        out_shape=jax.ShapeDtypeStruct((rows, features), out_dtype),
        grid_spec=pltpu.PrefetchScalarGridSpec(
            num_scalar_prefetch=0,
            grid=grid,
            in_specs=[
                pl.BlockSpec((tile_rows, features), lambda i: (i, 0)),
                pl.BlockSpec((1, features), lambda i: (0, 0)),
                pl.BlockSpec((1, features), lambda i: (0, 0)),
            ],
            out_specs=pl.BlockSpec((tile_rows, features), lambda i: (i, 0)),
        ),
        compiler_params=pltpu.CompilerParams(
            # "parallel" lets the row loop shard across both TensorCores on v7x;
            # harmless no-op on single-TC v5e/v6e.
            dimension_semantics=("parallel",),
            vmem_limit_bytes=_vmem_limit_bytes(tile_rows, features, x.dtype, out_dtype),
        ),
    )(x2, a2, b2)

    return out.reshape(*lead_shape, features)


def _reference(x, a_2, b_2, eps=1e-6):
    x = x.astype(jnp.float32)
    mean = jnp.mean(x, axis=-1, keepdims=True)
    var = jnp.var(x, axis=-1, keepdims=True, ddof=1)   # unbiased, like torch.std
    std = jnp.sqrt(var)
    return a_2 * (x - mean) / (std + eps) + b_2


if __name__ == "__main__":
    key = jax.random.PRNGKey(0)

    # Primary check: shapes implied by the module (batch=2, seq=8, features=32).
    batch, seq, features = 2, 8, 32
    x = jax.random.normal(key, (batch, seq, features), dtype=jnp.float32)
    # nn.Parameter(torch.ones(features)) / torch.zeros(features)
    a_2 = jnp.ones((features,), dtype=jnp.float32)
    b_2 = jnp.zeros((features,), dtype=jnp.float32)

    out = layer_norm(x, a_2, b_2, eps=1e-6)
    out = jax.block_until_ready(out)
    ref = _reference(x, a_2, b_2, eps=1e-6)
    assert out.shape == x.shape
    assert jnp.allclose(out, ref, atol=1e-5, rtol=1e-5), "mismatch vs reference (32)"

    # Secondary check: lane-dense feature width (multiple of 128) and a row count
    # that does not divide the chosen tile, exercising the pl.cdiv boundary block.
    f2 = 128
    x2 = jax.random.normal(jax.random.PRNGKey(1), (4, 5, f2), dtype=jnp.float32)
    a2 = jnp.ones((f2,), dtype=jnp.float32)
    b2 = jnp.zeros((f2,), dtype=jnp.float32)
    out2 = jax.block_until_ready(layer_norm(x2, a2, b2, eps=1e-6, tile_rows=16))
    ref2 = _reference(x2, a2, b2, eps=1e-6)
    assert out2.shape == x2.shape
    assert jnp.allclose(out2, ref2, atol=1e-5, rtol=1e-5), "mismatch vs reference (128)"

    print("KERNEL_OK")
</pallas_src>

<mosaic_0001>
module attributes {stable_mosaic.version = 11 : i64} {
  func.func @_layernorm_kernel(%arg0: i32, %arg1: memref<16x32xf32, #tpu.memory_space<vmem>>, %arg2: memref<1x32xf32, #tpu.memory_space<vmem>>, %arg3: memref<1x32xf32, #tpu.memory_space<vmem>>, %arg4: memref<16x32xf32, #tpu.memory_space<vmem>>) attributes {dimension_semantics = [#tpu.dimension_semantics<parallel>], iteration_bounds = array<i64: 1>, scalar_prefetch = 0 : i64, scratch_operands = 0 : i64, tpu.core_type = #tpu.core_type<tc>, window_params = [{transform_indices = @transform_0, window_bounds = array<i64: 16, 32>}, {pipeline_mode = #tpu.pipeline_mode<synchronous>, transform_indices = @transform_1, window_bounds = array<i64: 1, 32>}, {pipeline_mode = #tpu.pipeline_mode<synchronous>, transform_indices = @transform_2, window_bounds = array<i64: 1, 32>}, {transform_indices = @transform_3, window_bounds = array<i64: 16, 32>}]} {
    %c0 = arith.constant 0 : index
    %c0_0 = arith.constant 0 : index
    %0 = vector.load %arg1[%c0, %c0_0] : memref<16x32xf32, #tpu.memory_space<vmem>>, vector<16x32xf32>
    %cst = arith.constant dense<0.000000e+00> : vector<16xf32>
    %1 = vector.multi_reduction <add>, %0, %cst [1] : vector<16x32xf32> to vector<16xf32>
    %2 = vector.shape_cast %1 : vector<16xf32> to vector<16x1xf32>
    %3 = arith.mulf %0, %0 : vector<16x32xf32>
    %cst_1 = arith.constant dense<0.000000e+00> : vector<16xf32>
    %4 = vector.multi_reduction <add>, %3, %cst_1 [1] : vector<16x32xf32> to vector<16xf32>
    %5 = vector.shape_cast %4 : vector<16xf32> to vector<16x1xf32>
    %cst_2 = arith.constant 3.125000e-02 : f32
    %6 = vector.broadcast %cst_2 : f32 to vector<16x1xf32>
    %7 = arith.mulf %2, %6 : vector<16x1xf32>
    %cst_3 = arith.constant 3.200000e+01 : f32
    %8 = vector.broadcast %cst_3 : f32 to vector<16x1xf32>
    %9 = arith.mulf %8, %7 : vector<16x1xf32>
    %10 = arith.mulf %9, %7 : vector<16x1xf32>
    %11 = arith.subf %5, %10 : vector<16x1xf32>
    %cst_4 = arith.constant 0.0322580636 : f32
    %12 = vector.broadcast %cst_4 : f32 to vector<16x1xf32>
    %13 = arith.mulf %11, %12 : vector<16x1xf32>
    %cst_5 = arith.constant 0.000000e+00 : f32
    %14 = vector.broadcast %cst_5 : f32 to vector<16x1xf32>
    %15 = arith.maximumf %13, %14 : vector<16x1xf32>
    %16 = math.sqrt %15 : vector<16x1xf32>
    %cst_6 = arith.constant 9.99999997E-7 : f32
    %17 = vector.broadcast %cst_6 : f32 to vector<16x1xf32>
    %18 = arith.addf %16, %17 : vector<16x1xf32>
    %cst_7 = arith.constant 1.000000e+00 : f32
    %19 = vector.broadcast %cst_7 : f32 to vector<16x1xf32>
    %20 = arith.divf %19, %18 : vector<16x1xf32>
    %c0_8 = arith.constant 0 : index
    %c0_9 = arith.constant 0 : index
    %21 = vector.load %arg2[%c0_8, %c0_9] : memref<1x32xf32, #tpu.memory_space<vmem>>, vector<1x32xf32>
    %c0_10 = arith.constant 0 : index
    %c0_11 = arith.constant 0 : index
    %22 = vector.load %arg3[%c0_10, %c0_11] : memref<1x32xf32, #tpu.memory_space<vmem>>, vector<1x32xf32>
    %23 = vector.broadcast %7 : vector<16x1xf32> to vector<16x32xf32>
    %24 = arith.subf %0, %23 : vector<16x32xf32>
    %25 = vector.broadcast %20 : vector<16x1xf32> to vector<16x32xf32>
    %26 = arith.mulf %24, %25 : vector<16x32xf32>
    %27 = vector.broadcast %21 : vector<1x32xf32> to vector<16x32xf32>
    %28 = arith.mulf %27, %26 : vector<16x32xf32>
    %29 = vector.broadcast %22 : vector<1x32xf32> to vector<16x32xf32>
    %30 = arith.addf %28, %29 : vector<16x32xf32>
    %c0_12 = arith.constant 0 : index
    %c0_13 = arith.constant 0 : index
    %31 = vector.load %arg4[%c0_12, %c0_13] : memref<16x32xf32, #tpu.memory_space<vmem>>, vector<16x32xf32>
    tpu.vector_store %arg4[%c0_12, %c0_13], %30 {strides = array<i32>} : memref<16x32xf32, #tpu.memory_space<vmem>>, vector<16x32xf32>,
    return
  }
  func.func @transform_0(%arg0: i32) -> (i32, i32) {
    %c0_i32 = arith.constant 0 : i32
    %c0_i32_0 = arith.constant 0 : i32
    return %arg0, %c0_i32 : i32, i32
  }
  func.func @transform_1(%arg0: i32) -> (i32, i32) {
    %c0_i32 = arith.constant 0 : i32
    %c0_i32_0 = arith.constant 0 : i32
    %c0_i32_1 = arith.constant 0 : i32
    return %c0_i32, %c0_i32_0 : i32, i32
  }
  func.func @transform_2(%arg0: i32) -> (i32, i32) {
    %c0_i32 = arith.constant 0 : i32
    %c0_i32_0 = arith.constant 0 : i32
    %c0_i32_1 = arith.constant 0 : i32
    return %c0_i32, %c0_i32_0 : i32, i32
  }
  func.func @transform_3(%arg0: i32) -> (i32, i32) {
    %c0_i32 = arith.constant 0 : i32
    %c0_i32_0 = arith.constant 0 : i32
    return %arg0, %c0_i32 : i32, i32
  }
}

</mosaic_0001>

<bundles_post_ra>
// kernel: tpu_custom_call.1
= control target key start
LH: loop header
LB: loop body
LE: loop exit
PB: predicated region body
PF: predicated region fallthrough
CT: control target
= control target key end

     0   :  { %8 = vsyncpa [#allocation3], 0  ;;  %s247_s0 = inlined_call_operand.hbm [shape: f32[16,32], index: 0, kind: input, shape index: {}]   ;;  %s248_s1 = inlined_call_operand.vmem [shape: f32[1,32], index: 1, kind: input, shape index: {}]   ;;  %s249_s2 = inlined_call_operand.vmem [shape: f32[1,32], index: 2, kind: input, shape index: {}]   ;;  %s250_s3 = inlined_call_operand.hbm [shape: f32[16,32], index: 3, kind: output, shape index: {}]  }
   0x1   :  { %9 = vsyncpa [#allocation4], 0  ;;  %s181_s12 = smov [#allocation2]   ;;  %s133_s16 = scalar_lea.hbm %s247_s0, 256 }
   0x2   :  { %s15_s13 = sshll.u32 %s181_s12, 4  ;;  %p134_p0 = scmp.ne.s32.totalorder %s247_s0, %s133_s16  ;;  %s16_s13 = int_to_ptr.vmem [resolvable:$true] %s15_s13 }
   0x3   :  { %p137_p1 = scmp.lt.u32.totalorder %s133_s16, %s247_s0 }
   0x5   :  { %p139_p2 = pnand %p137_p1, %p134_p0 }
   0x7   :  { %142 = shalt.err (!%p139_p2)
}
   0x8   :  { %s143_s21 = scalar_lea.vmem %s16_s13, 256  ;;  %p148_p4 = scmp.lt.s32.totalorder %s16_s13, %s16_s13 }
   0x9   :  { %p144_p3 = scmp.ne.s32.totalorder %s16_s13, %s143_s21  ;;  %p149_p5 = scmp.lt.s32.totalorder %s143_s21, %s143_s21 }
   0xb   :  { %p150_p6 = por %p149_p5, %p148_p4 }
   0xd   :  { %p151_p7 = pnand %p150_p6, %p144_p3 }
   0xf   :  { %154 = shalt.err (!%p151_p7)
}
  0x10   :  { %s182_s22 = smov 128   ;;  %s183_s23 = smov 8  }
  0x11   :  { %21 = dma.hbm_to_vmem [thread:$0]  %s247_s0, 256, %s16_s13, [#allocation3], %s182_s22, %s182_s22, %s183_s23  }
  0x12   :  { %177 = dma.done.wait [#allocation3], 256  }
  0x13   :  { %178 = vsyncadd [#allocation3], 4294967040  ;;  %vm31_vm0 = vcmask 261120   ;;  %v29_v0 = vld [vmem:[#allocation2] sm:$0xff]  ;;  %v30_v1 = vld [vmem:[#allocation2 + $0x8] sm:$0xff]  ;;  %s184_s29 = smov [#allocation5]  }
  0x14   :  { %v32_v2 = vsel %vm31_vm0, %v29_v0, 0.0  ;;  %v38_v3 = vmul.f32 %v29_v0, %v29_v0  ;;  %v39_v4 = vmul.f32 %v30_v1, %v30_v1  ;;  %v35_v5 = vsel %vm31_vm0, %v30_v1, 0.0  ;;  %v119_v38 = vld [vmem:[%s248_s1] ss:$0 sm:$0xff]  ;;  %s107_s30 = sshll.u32 %s184_s29, 4  ;;  %s108_s30 = int_to_ptr.vmem [resolvable:$true] %s107_s30 }
  0x15   :  { %33 = vadd.xlane.f32.xlu0 %v32_v2  ;;  %v120_v40 = vld [vmem:[%s249_s2] ss:$0 sm:$0xff]  ;;  %s155_s1 = scalar_lea.vmem %s108_s30, 256  ;;  %p160_p9 = scmp.lt.s32.totalorder %s108_s30, %s108_s30 }
  0x16   :  { %v40_v6 = vsel %vm31_vm0, %v38_v3, 0.0  ;;  %v43_v7 = vsel %vm31_vm0, %v39_v4, 0.0  ;;  %p156_p8 = scmp.ne.s32.totalorder %s108_s30, %s155_s1  ;;  %p161_p10 = scmp.lt.s32.totalorder %s155_s1, %s155_s1 }
  0x17   :  { %41 = vadd.xlane.f32.xlu1 %v40_v6 }
  0x18   :  { %p162_p11 = por %p161_p10, %p160_p9 }
  0x19   :  { %36 = vadd.xlane.f32.xlu0 %v35_v5 }
  0x1a   :  { %p163_p12 = pnand %p162_p11, %p156_p8 }
  0x1b   :  { %44 = vadd.xlane.f32.xlu1 %v43_v7 }
  0xa2   :  { %v34_v8 = vpop.xlane.xlu0 %33 }
  0xa3   :  { %v46_v9 = vmul.f32 0.03125, %v34_v8 }
  0xa4   :  { %v42_v10 = vpop.xlane.xlu1 %41 }
  0xa5   :  { %v48_v11 = vmul.f32 32.0, %v46_v9  ;;  %v80_v36 = vsub.f32 %v29_v0, %v46_v9 }
  0xa6   :  { %v37_v12 = vpop.xlane.xlu0 %36 }
  0xa7   :  { %v47_v13 = vmul.f32 0.03125, %v37_v12  ;;  %v50_v14 = vmul.f32 %v48_v11, %v46_v9 }
  0xa8   :  { %v45_v17 = vpop.xlane.xlu1 %44 }
  0xa9   :  { %v49_v15 = vmul.f32 32.0, %v47_v13  ;;  %v52_v16 = vsub.f32 %v42_v10, %v50_v14  ;;  %v81_v42 = vsub.f32 %v30_v1, %v47_v13 }
  0xab   :  { %v54_v18 = vmul.f32 0.032258064, %v52_v16  ;;  %v51_v19 = vmul.f32 %v49_v15, %v47_v13 }
  0xad   :  { %v56_v20 = vmax.f32 %v54_v18, 0.0  ;;  %v53_v21 = vsub.f32 %v45_v17, %v51_v19 }
  0xaf   :  { %125 = vrsqrt.f32 %v56_v20  ;;  %v55_v22 = vmul.f32 0.032258064, %v53_v21  ;;  %vm60_vm1 = vcmp.eq.f32.partialorder %v56_v20, inf  ;;  %v63_v26 = vand.u32 2147483648, %v56_v20 }
  0xb0   :  { %vm62_vm2 = vcmp.eq.f32.partialorder %v56_v20, 0.0 }
  0xb1   :  { %v57_v23 = vmax.f32 %v55_v22, 0.0 }
  0xb3   :  { %127 = vrsqrt.f32 %v57_v23  ;;  %vm67_vm3 = vcmp.eq.f32.partialorder %v57_v23, inf  ;;  %v70_v32 = vand.u32 2147483648, %v57_v23  ;;  %vm69_vm4 = vcmp.eq.f32.partialorder %v57_v23, 0.0 }
  0xb9   :  { %v126_v24 = vpop.eup %125 }
  0xba   :  { %v59_v25 = vmul.f32 %v126_v24, %v56_v20 }
  0xbc   :  { %v61_v27 = vsel %vm60_vm1, %v56_v20, %v59_v25 }
  0xbd   :  { %v64_v28 = vsel %vm62_vm2, %v63_v26, %v61_v27  ;;  %v128_v29 = vpop.eup %127 }
  0xbe   :  { %v72_v30 = vadd.f32 1e-06, %v64_v28  ;;  %v66_v31 = vmul.f32 %v128_v29, %v57_v23 }
  0xc0   :  { %129 = vrcp.f32 %v72_v30  ;;  %v68_v33 = vsel %vm67_vm3, %v57_v23, %v66_v31 }
  0xc1   :  { %v71_v34 = vsel %vm69_vm4, %v70_v32, %v68_v33 }
  0xc2   :  { %v73_v35 = vadd.f32 1e-06, %v71_v34 }
  0xc4   :  { %131 = vrcp.f32 %v73_v35 }
  0xca   :  { %v130_v37 = vpop.eup %129 }
  0xcb   :  { %v82_v39 = vmul.f32 %v130_v37, %v80_v36 }
  0xcd   :  { %v90_v41 = vmul.f32 %v119_v38, %v82_v39 }
  0xce   :  { %v132_v43 = vpop.eup %131 }
  0xcf   :  { %v98_v44 = vadd.f32 %v120_v40, %v90_v41  ;;  %v83_v45 = vmul.f32 %v132_v43, %v81_v42 }
  0xd1   :  { %100 = vst.msk [vmem:[#allocation5] sm:$0xff] %vm31_vm0, %v98_v44  ;;  %v91_v46 = vmul.f32 %v119_v38, %v83_v45 }
  0xd3   :  { %v99_v47 = vadd.f32 %v120_v40, %v91_v46 }
  0xd5   :  { %101 = vst.msk [vmem:[#allocation5 + $0x8] sm:$0xff] %vm31_vm0, %v99_v47 }
  0xd6   :  { %166 = shalt.err (!%p163_p12)
}
  0xd7   :  { %s167_s5 = scalar_lea.hbm %s250_s3, 256 }
  0xd8   :  { %p168_p13 = scmp.ne.s32.totalorder %s250_s3, %s167_s5  ;;  %p171_p0 = scmp.lt.u32.totalorder %s167_s5, %s250_s3 }
  0xda   :  { %p173_p1 = pnand %p171_p0, %p168_p13 }
  0xdc   :  { %176 = shalt.err (!%p173_p1)
}
  0xdd   :  { %113 = dma.vmem_to_hbm [thread:$0]  %s108_s30, 256, %s250_s3, [#allocation4], %s182_s22, %s182_s22, %s183_s23  }
  0xde   :  { %179 = dma.done.wait [#allocation4], 256  }
  0xdf   :  { %180 = vsyncadd [#allocation4], 4294967040 }
  0xe0   :  { %117 = vsyncpa [#allocation3], 1 }
  0xe1   :  { %118 = vsyncpa [#allocation4], 1 }

</bundles_post_ra>
